<compile_context>
chip_gen: v7x
topology: tpu7x:2x2x1
jax: 0.10.0
libtpu: 0.0.40
codegen_flags: <defaults>
</compile_context>

<pallas_src>
import jax
import jax.numpy as jnp
from jax.experimental import pallas as pl
from jax.experimental.pallas import tpu as pltpu


def _model_kernel(lhs_ref, rhs_ref, out_ref, z3_ref):
    # Single fused MXU matmul: rows 0..COUT-1 = conv1 output v, rows
    # COUT..2*COUT-1 = conv2 output t (already replicated per spatial column),
    # both biases folded in via the ones-rows of the RHS.
    r = jnp.dot(lhs_ref[...], rhs_ref[...],
                preferred_element_type=jnp.float32)        # (2*COUT, 128)
    cout = out_ref.shape[1]
    v = r[:cout, :]                                         # (8, 128), 1 vreg
    t = r[cout:2 * cout, :]                                 # (8, 128), 1 vreg

    # Store order keeps live ranges short: only v/t, then ratio, then q live.
    out_ref[4] = v * v                                      # z6 = v ** 2
    out_ref[0] = v - t                                      # z1 = v - t

    ratio = v / t            # exact IEEE divide (t != 0 even in pad lanes)
    out_ref[1] = ratio                                      # z2 = v / t

    # Pad lanes of v are exactly 0 and t is nonzero there, so ratio is exactly
    # 0 in the pad lanes and the full-tile sum equals the sum over real data.
    z3 = jnp.sum(jnp.sum(ratio, axis=1, keepdims=True), axis=0, keepdims=True)
    z3_ref[...] = jnp.broadcast_to(z3, z3_ref.shape)        # one small tile

    q = jnp.floor(ratio)
    out_ref[2] = q                                          # z4 = v // t
    out_ref[3] = v - q * t                                  # z5 = v %  t


def prepare_params(w1, b1, w2, b2, in_w):
    """One-time weight prep: block-diagonal LHS for the fused MXU matmul.

    Columns: [w1 (cin) | b1 (1) | w2_folded (3*in_w*cin) | b2 (1) | zero pad].
    conv2's receptive field for its single output position covers input rows
    0..2 and input cols -1..in_w-1; the kw=0 tap hits the zero-pad column and
    is dropped (folded) here.
    """
    cout, cin = w1.shape[0], w1.shape[1]
    k2 = 3 * in_w * cin
    w1m = w1.reshape(cout, cin)
    w2m = w2[:, :, :, 1:1 + in_w].transpose(0, 2, 3, 1).reshape(cout, k2)
    top = jnp.concatenate(
        [w1m, b1[:, None], jnp.zeros((cout, k2 + 1), w1.dtype)], axis=1)
    bot = jnp.concatenate(
        [jnp.zeros((cout, cin + 1), w1.dtype), w2m, b2[:, None]], axis=1)
    lhs = jnp.concatenate([top, bot], axis=0)               # (2*cout, cin+k2+2)
    k = lhs.shape[1]
    kp = ((k + 7) // 8) * 8
    return jnp.pad(lhs, ((0, 0), (0, kp - k)))              # (16, 24)


@jax.jit
def run_model(x, lhs):
    n, cin, h, w = x.shape
    cout = lhs.shape[0] // 2
    kp = lhs.shape[1]
    h1, w1sp = h + 2, w + 2                 # conv1 output spatial (k=1,s=1,p=1)
    hw = h1 * w1sp                          # 24 output positions per sample
    cols = n * hw                           # 96 real lanes
    lanes = max(128, ((cols + 127) // 128) * 128)

    # conv1 RHS rows: zero-padded input pixels (channels down, sample*spatial
    # across lanes) + a bias row that is 1 only in the real columns, so v == 0
    # exactly in the pad lanes.
    xp = jnp.pad(x, ((0, 0), (0, 0), (1, 1), (1, 1)))
    p1 = xp.transpose(1, 0, 2, 3).reshape(cin, cols)
    # conv2 RHS rows: the single 3x3 patch per sample (zero-pad column already
    # folded into the weights), replicated over that sample's hw positions, so
    # t comes out pre-broadcast and the kernel stays pure elementwise.
    p2 = x[:, :, 0:3, :].transpose(2, 3, 1, 0).reshape(3 * w * cin, n)
    p2 = jnp.repeat(p2, hw, axis=1)                          # (18, cols)

    rhs = jnp.concatenate([p1, jnp.ones((1, cols), x.dtype), p2], axis=0)
    rhs = jnp.pad(rhs, ((0, 0), (0, lanes - cols)))
    # conv2 bias row is 1 in *every* lane -> t = b2 (nonzero) in the pad lanes,
    # so every padded ratio / floor / mod is finite (and exactly 0).
    rhs = jnp.concatenate([rhs, jnp.ones((1, lanes), x.dtype)], axis=0)
    rhs = jnp.pad(rhs, ((0, kp - rhs.shape[0]), (0, 0)))     # (24, 128)

    zs, z3_tile = pl.pallas_call(
        _model_kernel,
        out_shape=(
            jax.ShapeDtypeStruct((5, cout, lanes), jnp.float32),  # z1,z2,z4,z5,z6
            jax.ShapeDtypeStruct((8, 128), jnp.float32),          # z3, one tile
        ),
        in_specs=[
            pl.BlockSpec(memory_space=pltpu.MemorySpace.VMEM),
            pl.BlockSpec(memory_space=pltpu.MemorySpace.VMEM),
        ],
        out_specs=(
            pl.BlockSpec(memory_space=pltpu.MemorySpace.VMEM),
            pl.BlockSpec(memory_space=pltpu.MemorySpace.VMEM),
        ),
    )(lhs, rhs)

    # One small (~20 KiB) fusion back to the PyTorch cat layout:
    # (zi, c, n*hw + s) -> (zi*N + n, c, h, w), inserting the broadcast z3.
    zs = zs[:, :, :cols].reshape(5, cout, n, hw).transpose(0, 2, 1, 3)
    z3b = jnp.broadcast_to(z3_tile[0, 0], (1, n, cout, hw))
    full = jnp.concatenate([zs[0:2], z3b, zs[2:5]], axis=0)   # (6, n, cout, hw)
    return full.reshape(6 * n, cout, h1, w1sp)


if __name__ == "__main__":
    N, CIN, H, W = 4, 3, 4, 2   # small shapes consistent with the module (see TODO)
    COUT = 8

    key = jax.random.PRNGKey(0)
    k1, k2, k3, k4, k5 = jax.random.split(key, 5)
    x = jax.random.normal(k1, (N, CIN, H, W), jnp.float32)
    w1 = jax.random.normal(k2, (COUT, CIN, 1, 1), jnp.float32) * 0.5
    b1 = jax.random.normal(k3, (COUT,), jnp.float32) * 0.1
    w2 = jax.random.normal(k4, (COUT, CIN, 3, 3), jnp.float32) * 0.1
    # Keep |t| comfortably away from 0 so ratio / floor / mod are well
    # conditioned for the tolerance-based checks below.
    b2 = 2.0 + 0.1 * jax.random.normal(k5, (COUT,), jnp.float32)

    lhs = prepare_params(w1, b1, w2, b2, W)          # hoisted: computed once
    out = jax.block_until_ready(run_model(x, lhs))

    H1, W1 = H + 2, W + 2
    assert out.shape == (6 * N, COUT, H1, W1)
    assert bool(jnp.all(jnp.isfinite(out)))

    # Plain-JAX reference (full conv2 including its zero-pad column, so it also
    # cross-checks the weight-column folding done in prepare_params).
    xpad1 = jnp.pad(x, ((0, 0), (0, 0), (1, 1), (1, 1)))
    v_ref = (jnp.einsum("nchw,oc->nohw", xpad1, w1.reshape(COUT, CIN))
             + b1.reshape(1, COUT, 1, 1))
    xpad2 = jnp.pad(x, ((0, 0), (0, 0), (0, 0), (1, 1)))
    patch = xpad2[:, :, 0:3, 0:3].reshape(N, CIN * 9)
    t_ref = (patch @ w2.reshape(COUT, CIN * 9).T + b2).reshape(N, COUT, 1, 1)

    ratio_ref = v_ref / t_ref
    q_ref = jnp.floor(ratio_ref)
    tol = dict(rtol=1e-2, atol=1e-2)

    assert bool(jnp.allclose(out[0 * N:1 * N], v_ref - t_ref, **tol))        # z1
    assert bool(jnp.allclose(out[1 * N:2 * N], ratio_ref, **tol))            # z2
    assert bool(jnp.allclose(out[2 * N:3 * N], jnp.sum(ratio_ref),
                             rtol=1e-2, atol=0.5))                           # z3
    # z4/z5: floor may legitimately differ where v/t is within rounding noise
    # of an integer; elsewhere it must match exactly, and z5 must be
    # consistent with the kernel's own floor.
    q_ker = out[3 * N:4 * N]
    near_int = jnp.abs(ratio_ref - jnp.round(ratio_ref)) < 1e-2
    assert bool(jnp.all((q_ker == q_ref) | near_int))                        # z4
    assert bool(jnp.allclose(out[4 * N:5 * N], v_ref - q_ker * t_ref, **tol))  # z5
    assert bool(jnp.allclose(out[5 * N:6 * N], v_ref * v_ref, **tol))        # z6

    print("KERNEL_OK")
</pallas_src>

<mosaic_0001>
module attributes {stable_mosaic.version = 11 : i64} {
  func.func @_model_kernel(%arg0: memref<16x24xf32, #tpu.memory_space<vmem>>, %arg1: memref<24x128xf32, #tpu.memory_space<vmem>>, %arg2: memref<5x8x128xf32, #tpu.memory_space<vmem>>, %arg3: memref<8x128xf32, #tpu.memory_space<vmem>>) attributes {dimension_semantics = [], scalar_prefetch = 0 : i64, scratch_operands = 0 : i64, tpu.core_type = #tpu.core_type<tc>} {
    %c0 = arith.constant 0 : index
    %c0_0 = arith.constant 0 : index
    %0 = vector.load %arg0[%c0, %c0_0] : memref<16x24xf32, #tpu.memory_space<vmem>>, vector<16x24xf32>
    %c0_1 = arith.constant 0 : index
    %c0_2 = arith.constant 0 : index
    %1 = vector.load %arg1[%c0_1, %c0_2] : memref<24x128xf32, #tpu.memory_space<vmem>>, vector<24x128xf32>
    %cst = arith.constant dense<0.000000e+00> : vector<16x128xf32>
    %2 = tpu.matmul %0, %1, %cst {dimension_numbers = #tpu.dot_dimension_numbers<[1], [0], [0], [1], [0, 0, 1, 1], [], []>} : vector<16x24xf32>, vector<24x128xf32>, vector<16x128xf32> -> vector<16x128xf32>
    %3 = vector.extract_strided_slice %2 {offsets = [0, 0], sizes = [8, 128], strides = [1, 1]} : vector<16x128xf32> to vector<8x128xf32>
    %4 = vector.extract_strided_slice %2 {offsets = [8, 0], sizes = [8, 128], strides = [1, 1]} : vector<16x128xf32> to vector<8x128xf32>
    %5 = arith.mulf %3, %3 : vector<8x128xf32>
    %c4 = arith.constant 4 : index
    %c0_3 = arith.constant 0 : index
    %c0_4 = arith.constant 0 : index
    %6 = vector.load %arg2[%c4, %c0_3, %c0_4] : memref<5x8x128xf32, #tpu.memory_space<vmem>>, vector<1x8x128xf32>
    %7 = vector.shape_cast %6 : vector<1x8x128xf32> to vector<8x128xf32>
    %8 = vector.shape_cast %5 : vector<8x128xf32> to vector<1x8x128xf32>
    tpu.vector_store %arg2[%c4, %c0_3, %c0_4], %8 {strides = array<i32>} : memref<5x8x128xf32, #tpu.memory_space<vmem>>, vector<1x8x128xf32>,
    %9 = arith.subf %3, %4 : vector<8x128xf32>
    %c0_5 = arith.constant 0 : index
    %c0_6 = arith.constant 0 : index
    %c0_7 = arith.constant 0 : index
    %10 = vector.load %arg2[%c0_5, %c0_6, %c0_7] : memref<5x8x128xf32, #tpu.memory_space<vmem>>, vector<1x8x128xf32>
    %11 = vector.shape_cast %10 : vector<1x8x128xf32> to vector<8x128xf32>
    %12 = vector.shape_cast %9 : vector<8x128xf32> to vector<1x8x128xf32>
    tpu.vector_store %arg2[%c0_5, %c0_6, %c0_7], %12 {strides = array<i32>} : memref<5x8x128xf32, #tpu.memory_space<vmem>>, vector<1x8x128xf32>,
    %13 = arith.divf %3, %4 : vector<8x128xf32>
    %c1 = arith.constant 1 : index
    %c0_8 = arith.constant 0 : index
    %c0_9 = arith.constant 0 : index
    %14 = vector.load %arg2[%c1, %c0_8, %c0_9] : memref<5x8x128xf32, #tpu.memory_space<vmem>>, vector<1x8x128xf32>
    %15 = vector.shape_cast %14 : vector<1x8x128xf32> to vector<8x128xf32>
    %16 = vector.shape_cast %13 : vector<8x128xf32> to vector<1x8x128xf32>
    tpu.vector_store %arg2[%c1, %c0_8, %c0_9], %16 {strides = array<i32>} : memref<5x8x128xf32, #tpu.memory_space<vmem>>, vector<1x8x128xf32>,
    %cst_10 = arith.constant dense<0.000000e+00> : vector<8xf32>
    %17 = vector.multi_reduction <add>, %13, %cst_10 [1] : vector<8x128xf32> to vector<8xf32>
    %18 = vector.shape_cast %17 : vector<8xf32> to vector<8x1xf32>
    %cst_11 = arith.constant dense<0.000000e+00> : vector<1xf32>
    %19 = vector.multi_reduction <add>, %18, %cst_11 [0] : vector<8x1xf32> to vector<1xf32>
    %20 = vector.shape_cast %19 : vector<1xf32> to vector<1x1xf32>
    %21 = vector.shape_cast %20 : vector<1x1xf32> to vector<1x1xf32>
    %22 = vector.broadcast %21 : vector<1x1xf32> to vector<8x128xf32>
    %c0_12 = arith.constant 0 : index
    %c0_13 = arith.constant 0 : index
    %23 = vector.load %arg3[%c0_12, %c0_13] : memref<8x128xf32, #tpu.memory_space<vmem>>, vector<8x128xf32>
    tpu.vector_store %arg3[%c0_12, %c0_13], %22 {strides = array<i32>} : memref<8x128xf32, #tpu.memory_space<vmem>>, vector<8x128xf32>,
    %24 = math.floor %13 : vector<8x128xf32>
    %c2 = arith.constant 2 : index
    %c0_14 = arith.constant 0 : index
    %c0_15 = arith.constant 0 : index
    %25 = vector.load %arg2[%c2, %c0_14, %c0_15] : memref<5x8x128xf32, #tpu.memory_space<vmem>>, vector<1x8x128xf32>
    %26 = vector.shape_cast %25 : vector<1x8x128xf32> to vector<8x128xf32>
    %27 = vector.shape_cast %24 : vector<8x128xf32> to vector<1x8x128xf32>
    tpu.vector_store %arg2[%c2, %c0_14, %c0_15], %27 {strides = array<i32>} : memref<5x8x128xf32, #tpu.memory_space<vmem>>, vector<1x8x128xf32>,
    %28 = arith.mulf %24, %4 : vector<8x128xf32>
    %29 = arith.subf %3, %28 : vector<8x128xf32>
    %c3 = arith.constant 3 : index
    %c0_16 = arith.constant 0 : index
    %c0_17 = arith.constant 0 : index
    %30 = vector.load %arg2[%c3, %c0_16, %c0_17] : memref<5x8x128xf32, #tpu.memory_space<vmem>>, vector<1x8x128xf32>
    %31 = vector.shape_cast %30 : vector<1x8x128xf32> to vector<8x128xf32>
    %32 = vector.shape_cast %29 : vector<8x128xf32> to vector<1x8x128xf32>
    tpu.vector_store %arg2[%c3, %c0_16, %c0_17], %32 {strides = array<i32>} : memref<5x8x128xf32, #tpu.memory_space<vmem>>, vector<1x8x128xf32>,
    return
  }
}

</mosaic_0001>

<bundles_post_ra>
// kernel: run_model.1
= control target key start
LH: loop header
LB: loop body
LE: loop exit
PB: predicated region body
PF: predicated region fallthrough
CT: control target
= control target key end

     0   :  { %vm18_vm0 = vcmask 195584   ;;  %s212_s1 = inlined_call_operand.vmem [shape: f32[24,128], index: 1, kind: input, shape index: {}]   ;;  %s213_s0 = inlined_call_operand.vmem [shape: f32[16,24], index: 0, kind: input, shape index: {}]   ;;  %s214_s2 = inlined_call_operand.vmem [shape: f32[5,8,128], index: 2, kind: output, shape index: {0}]   ;;  %s215_s3 = inlined_call_operand.vmem [shape: f32[8,128], index: 3, kind: output, shape index: {1}]  }
   0x1   :  { %v15_v0 = vld [vmem:[%s212_s1] sm:$0xff]  ;;  %v16_v1 = vld [vmem:[%s212_s1 + $0x8] sm:$0xff]  ;;  %v17_v4 = vld [vmem:[%s212_s1 + $0x10] sm:$0xff] }
   0x2   :  { %v153_v2 = vpack.c.bf16 %v16_v1, %v15_v0  ;;  %v13_v3 = vld [vmem:[%s213_s0] sm:$0xff]  ;;  %v14_v5 = vld [vmem:[%s213_s0 + $0x8] sm:$0xff] }
   0x3   :  { %150 = vmatprep.mubr.msk.f32.mxu0 %vm18_vm0, %v13_v3 }
   0x4   :  { %154 = vmatprep.subr.bf16.mxu0 %v153_v2 }
   0x5   :  { %156 = vmatpush3.bf16.msra.mxu0 %v153_v2 }
   0x6   :  { %148 = vmatprep.subr.mxu0 %v17_v4 }
   0x9   :  { %149 = vmatpush3.msra.mxu0 %v17_v4 }
   0xa   :  { %151 = vmatmul.mubr.msk.f32.vlgmr.msra.gmra.mrb[0].mxu0 %vm18_vm0, %v14_v5 }
  0xdd   :  { %v152_v6 = vpop.f32.mrb[0].mxu0 }
  0xde   :  { %157 = vrcp.f32 %v152_v6  ;;  %v91_v7 = vpop.f32.mrb[1].mxu0 }
  0xdf   :  { %v100_v8 = vmul.f32 %v91_v7, %v91_v7  ;;  %v103_v9 = vsub.f32 %v91_v7, %v152_v6 }
  0xe1   :  { %135 = vst [vmem:[%s214_s2 + $0x20] sm:$0xff] %v100_v8  ;;  %104 = vst [vmem:[%s214_s2] sm:$0xff] %v103_v9 }
  0xe8   :  { %v158_v10 = vpop.eup %157 }
  0xe9   :  { %v106_v11 = vmul.f32 %v158_v10, %v91_v7 }
  0xeb   :  { %136 = vst [vmem:[%s214_s2 + $0x8] sm:$0xff] %v106_v11  ;;  %v118_v12 = vfloor.f32 %v106_v11  ;;  %109 = vadd.xlane.f32.xlu0 %v106_v11 }
  0xed   :  { %137 = vst [vmem:[%s214_s2 + $0x10] sm:$0xff] %v118_v12  ;;  %v121_v13 = vmul.f32 %v152_v6, %v118_v12 }
  0xef   :  { %v122_v14 = vsub.f32 %v91_v7, %v121_v13 }
  0xf1   :  { %138 = vst [vmem:[%s214_s2 + $0x18] sm:$0xff] %v122_v14 }
 0x178   :  { %v110_v15 = vpop.xlane.xlu0 %109 }
 0x179   :  { %v111_v16 = vrot.slane %v110_v15, 4 }
 0x17b   :  { %v112_v17 = vadd.f32 %v111_v16, %v110_v15 }
 0x17d   :  { %v113_v18 = vrot.slane %v112_v17, 2 }
 0x17f   :  { %v114_v19 = vadd.f32 %v113_v18, %v112_v17 }
 0x181   :  { %v115_v20 = vrot.slane %v114_v19, 1 }
 0x183   :  { %v116_v21 = vadd.f32 %v115_v20, %v114_v19 }
 0x185   :  { %117 = vst [vmem:[%s215_s3] sm:$0xff] %v116_v21 }

</bundles_post_ra>
